<compile_context>
chip_gen: v5e
topology: v5e:2x2
jax: 0.10.0
libtpu: 0.0.40
codegen_flags: <defaults>
</compile_context>

<pallas_src>
import functools

import jax
import jax.numpy as jnp
from jax import lax
from jax.experimental import pallas as pl
from jax.experimental.pallas import tpu as pltpu


def _mrconv_kernel(*refs, center_identity, two_dot):
    """Grid: (B, N_pad // tile_n); both axes parallel.

    refs (center_identity=False):
      x_ref : (1, C, Np)   f32  full node features (channel-major) for this batch
      xt_ref: (1, C, TN)   f32  this node tile of x (delivered by the pipeline)
      ii_ref: (1, K, TN)   i32  center indices   (edge_index[1]) for this node tile
      jj_ref: (1, K, TN)   i32  neighbor indices (edge_index[0]) for this node tile
      w_ref : (Cout, 2C)   f32  de-interleaved 1x1-conv weight, cols [0:C]->x, [C:2C]->mx
      b_ref : (Cout, 1)    f32  bias
      o_ref : (1, Cout, TN) f32 output tile
    (center_identity=True: ii_ref is omitted.)
    """
    if center_identity:
        x_ref, xt_ref, jj_ref, w_ref, b_ref, o_ref = refs
        ii_ref = None
    else:
        x_ref, xt_ref, ii_ref, jj_ref, w_ref, b_ref, o_ref = refs

    x_full = x_ref[0]                                   # (C, Np) f32
    x_bf = x_full.astype(jnp.bfloat16)                  # hoisted: bf16 gather operand
    jj = jj_ref[0]                                      # (K, TN) i32
    n_pad = x_full.shape[1]
    tile_n = jj.shape[1]
    k_neighbors = jj.shape[0]
    if not center_identity:
        ii = ii_ref[0]                                  # (K, TN) i32

    # one-hot row iota: iota[m, t] = m  (node index on sublanes, tile lane position)
    iota = lax.broadcasted_iota(jnp.int32, (n_pad, tile_n), 0)

    mx = None
    for k in range(k_neighbors):                        # K static & small -> unrolled
        sel_j = (iota == jj[k:k + 1, :]).astype(jnp.bfloat16)          # (Np, TN)
        if center_identity:
            d = jnp.dot(x_bf, sel_j, preferred_element_type=jnp.float32)
        else:
            sel_i = (iota == ii[k:k + 1, :]).astype(jnp.bfloat16)
            if two_dot:
                # small C: subtract the (C, TN) gather results (cheap, VPU) instead of
                # the (Np, TN) selectors (expensive); extra dot rides the idle MXU.
                d = (jnp.dot(x_bf, sel_j, preferred_element_type=jnp.float32)
                     - jnp.dot(x_bf, sel_i, preferred_element_type=jnp.float32))
            else:
                # larger C: fold gather(x_j) - gather(x_i) into a single MXU push.
                d = jnp.dot(x_bf, sel_j - sel_i, preferred_element_type=jnp.float32)
        mx = d if mx is None else jnp.maximum(mx, d)    # (C, TN) f32

    x_tile = xt_ref[0]                                  # (C, TN) f32 via pipeline
    if center_identity:
        # x_i == x_tile; subtract after the max. Round through bf16 so both sides of
        # the relative difference use the same precision as the gathered x_j values.
        mx = mx - x_tile.astype(jnp.bfloat16).astype(jnp.float32)

    # fused 1x1 conv + bias + ReLU: one dot over the [x | mx] channel stack
    feat = jnp.concatenate([x_tile, mx], axis=0)        # (2C, TN) f32
    out = jnp.dot(w_ref[...], feat, preferred_element_type=jnp.float32)   # (Cout, TN)
    out = out + b_ref[...]                              # bias broadcast over lanes
    o_ref[0] = jnp.maximum(out, 0.0).astype(o_ref.dtype)


def mrconv2d_forward(x, edge_index, weight, bias, *, center_identity=False, tile_n=256):
    """MRConv2d forward.

    x          : (B, Cin, N, 1)      float32   (PyTorch NCHW-style layout)
    edge_index : (2, B, N, K)        int32     [0]=neighbors (x_j), [1]=centers (x_i)
    weight     : (Cout, 2*Cin, 1, 1) float32   (nn.Conv2d 1x1 weight, torch layout)
    bias       : (Cout,)             float32
    center_identity: set True when edge_index[1][b,n,k] == n (ViG dense KNN); the
                     center gather is skipped and edge_index[1] is never read.
    returns    : (B, Cout, N, 1)     float32
    """
    B, C, N, one = x.shape
    assert one == 1
    K = edge_index.shape[-1]
    Cout = weight.shape[0]
    assert weight.shape[1] == 2 * C, "kernel assumes C == in_channels"

    # ---- glue (plain JAX): no feature transposes, only small index transposes ----
    x_cm = x[..., 0]                                             # (B, C, N) channel-major
    idx_j = jnp.transpose(edge_index[0].astype(jnp.int32), (0, 2, 1))    # (B, K, N)
    idx_i = None
    if not center_identity:
        idx_i = jnp.transpose(edge_index[1].astype(jnp.int32), (0, 2, 1))

    # torch cat interleaves channels [x_0, mx_0, x_1, mx_1, ...]; de-interleave the
    # 1x1 weight into [cols applied to x | cols applied to mx] for one fused dot.
    w2 = weight[:, :, 0, 0]                                      # (Cout, 2C)
    w_cat = jnp.concatenate([w2[:, 0::2], w2[:, 1::2]], axis=1)  # (Cout, 2C)
    b_col = bias.reshape(Cout, 1)

    # ---- node-axis tiling (selector scratch bounded to (Np, TN)) ----
    if N <= tile_n:
        if B == 1 and N > 128:
            # keep >=2 parallel grid steps so both v7x TensorCores get work
            tn = 128
            n_pad = ((N + 127) // 128) * 128
        else:
            tn, n_pad = N, N
    else:
        tn = tile_n                                              # multiple of 128
        n_pad = ((N + tn - 1) // tn) * tn
    if n_pad != N:
        pad = n_pad - N
        x_cm = jnp.pad(x_cm, ((0, 0), (0, 0), (0, pad)))
        idx_j = jnp.pad(idx_j, ((0, 0), (0, 0), (0, pad)))       # pad idx 0 is in-range;
        if idx_i is not None:                                    # padded outputs sliced off
            idx_i = jnp.pad(idx_i, ((0, 0), (0, 0), (0, pad)))
    n_tiles = n_pad // tn

    # two-dot subtract only pays off while the MXU has slack (small C)
    two_dot = (not center_identity) and (C <= 32)

    kernel = functools.partial(_mrconv_kernel,
                               center_identity=center_identity, two_dot=two_dot)

    in_specs = [
        pl.BlockSpec((1, C, n_pad), lambda b, t: (b, 0, 0)),     # full x (gather source)
        pl.BlockSpec((1, C, tn), lambda b, t: (b, 0, t)),        # x tile via pipeline
    ]
    args = [x_cm, x_cm]
    if not center_identity:
        in_specs.append(pl.BlockSpec((1, K, tn), lambda b, t: (b, 0, t)))
        args.append(idx_i)
    in_specs.append(pl.BlockSpec((1, K, tn), lambda b, t: (b, 0, t)))
    args.append(idx_j)
    in_specs += [
        pl.BlockSpec((Cout, 2 * C), lambda b, t: (0, 0)),
        pl.BlockSpec((Cout, 1), lambda b, t: (0, 0)),
    ]
    args += [w_cat, b_col]

    out_cm = pl.pallas_call(
        kernel,
        out_shape=jax.ShapeDtypeStruct((B, Cout, n_pad), jnp.float32),
        grid_spec=pltpu.PrefetchScalarGridSpec(
            num_scalar_prefetch=0,
            grid=(B, n_tiles),
            in_specs=in_specs,
            out_specs=pl.BlockSpec((1, Cout, tn), lambda b, t: (b, 0, t)),
        ),
        compiler_params=pltpu.CompilerParams(
            dimension_semantics=("parallel", "parallel"),
            # v7x has only 64 MiB physical VMEM/TC; 48 MiB leaves Mosaic headroom
            # (far above what this kernel actually needs; fine on v5e/v6e too).
            vmem_limit_bytes=48 * 1024 * 1024,
        ),
    )(*args)

    if n_pad != N:
        out_cm = out_cm[:, :, :N]
    return out_cm[..., None]                                     # (B, Cout, N, 1)


def _reference_forward(x, edge_index, weight, bias, gather_dtype=jnp.float32):
    """Pure-JAX mirror of the PyTorch MRConv2d forward (C == in_channels).

    gather_dtype mirrors the kernel's bf16 rounding of the gathered x_j/x_i values
    (the x branch of the concat stays f32 exactly as in the kernel).
    """
    B, C, N, _ = x.shape
    K = edge_index.shape[-1]
    xs = x[..., 0]                                               # (B, C, N)
    xs_g = xs.astype(gather_dtype).astype(jnp.float32)

    def gather(idx):                                             # (B, N, K) -> (B, C, N, K)
        arr = jnp.broadcast_to(xs_g[:, :, None, :], (B, C, N, N))
        idxb = jnp.broadcast_to(idx[:, None, :, :], (B, C, N, K))
        return jnp.take_along_axis(arr, idxb, axis=3)

    x_i = gather(edge_index[1])
    x_j = gather(edge_index[0])
    xj_max = jnp.max(x_j - x_i, axis=-1, keepdims=True)          # (B, C, N, 1)
    cat = jnp.stack([x, xj_max], axis=2).reshape(B, 2 * C, N, 1)  # interleaved channels
    w2 = weight[:, :, 0, 0]                                      # (Cout, 2C)
    out = jnp.einsum('oc,bcnk->bonk', w2, cat) + bias[None, :, None, None]
    return jnp.maximum(out, 0.0)


if __name__ == "__main__":
    master = jax.random.PRNGKey(0)

    def run_case(B, C, Cout, N, K, *, center_identity, tile_n, key):
        kx, ke, kw, kb = jax.random.split(key, 4)
        x = jax.random.normal(kx, (B, C, N, 1), dtype=jnp.float32)
        idx_j = jax.random.randint(ke, (B, N, K), 0, N, dtype=jnp.int32)
        if center_identity:
            idx_i = jnp.broadcast_to(
                jnp.arange(N, dtype=jnp.int32)[None, :, None], (B, N, K))
        else:
            idx_i = jax.random.randint(jax.random.fold_in(ke, 1), (B, N, K), 0, N,
                                       dtype=jnp.int32)
        edge_index = jnp.stack([idx_j, idx_i], axis=0)           # (2, B, N, K)
        weight = 0.1 * jax.random.normal(kw, (Cout, 2 * C, 1, 1), dtype=jnp.float32)
        bias = 0.1 * jax.random.normal(kb, (Cout,), dtype=jnp.float32)

        out = mrconv2d_forward(x, edge_index, weight, bias,
                               center_identity=center_identity, tile_n=tile_n)
        out = jax.block_until_ready(out)
        ref = _reference_forward(x, edge_index, weight, bias,
                                 gather_dtype=jnp.bfloat16)
        assert out.shape == (B, Cout, N, 1)
        assert jnp.allclose(out, ref, atol=5e-4, rtol=5e-4), "mismatch vs reference"

    k1, k2, k3, k4 = jax.random.split(master, 4)
    # 1) small general case (single node tile, arbitrary center indices, two-dot path)
    run_case(2, 4, 8, 16, 8, center_identity=False, tile_n=256, key=k1)
    # 2) ViG dense-KNN pattern (center index == node) -> fast path, idx_i never passed
    run_case(2, 4, 8, 16, 8, center_identity=True, tile_n=256, key=k2)
    # 3) node-axis tiling + padding (N=200 padded to 256, TN=128, 2 tiles)
    run_case(1, 8, 16, 200, 4, center_identity=False, tile_n=128, key=k3)
    # 4) larger C -> folded single-dot path; B=1 split branch (2 tiles of 128)
    run_case(1, 40, 16, 256, 4, center_identity=False, tile_n=256, key=k4)

    print("KERNEL_OK")
</pallas_src>

<mosaic_0001>
module attributes {stable_mosaic.version = 11 : i64} {
  func.func @_mrconv_kernel(%arg0: i32, %arg1: i32, %arg2: memref<1x4x16xf32, #tpu.memory_space<vmem>>, %arg3: memref<1x4x16xf32, #tpu.memory_space<vmem>>, %arg4: memref<1x8x16xi32, #tpu.memory_space<vmem>>, %arg5: memref<1x8x16xi32, #tpu.memory_space<vmem>>, %arg6: memref<8x8xf32, #tpu.memory_space<vmem>>, %arg7: memref<8x1xf32, #tpu.memory_space<vmem>>, %arg8: memref<1x8x16xf32, #tpu.memory_space<vmem>>) attributes {dimension_semantics = [#tpu.dimension_semantics<parallel>, #tpu.dimension_semantics<parallel>], iteration_bounds = array<i64: 2, 1>, scalar_prefetch = 0 : i64, scratch_operands = 0 : i64, tpu.core_type = #tpu.core_type<tc>, window_params = [{transform_indices = @transform_0, window_bounds = array<i64: 1, 4, 16>}, {transform_indices = @transform_1, window_bounds = array<i64: 1, 4, 16>}, {transform_indices = @transform_2, window_bounds = array<i64: 1, 8, 16>}, {transform_indices = @transform_3, window_bounds = array<i64: 1, 8, 16>}, {pipeline_mode = #tpu.pipeline_mode<synchronous>, transform_indices = @transform_4, window_bounds = array<i64: 8, 8>}, {pipeline_mode = #tpu.pipeline_mode<synchronous>, transform_indices = @transform_5, window_bounds = array<i64: 8, 1>}, {transform_indices = @transform_6, window_bounds = array<i64: 1, 8, 16>}]} {
    %c0 = arith.constant 0 : index
    %c0_0 = arith.constant 0 : index
    %c0_1 = arith.constant 0 : index
    %0 = vector.load %arg2[%c0, %c0_0, %c0_1] : memref<1x4x16xf32, #tpu.memory_space<vmem>>, vector<1x4x16xf32>
    %1 = vector.shape_cast %0 : vector<1x4x16xf32> to vector<4x16xf32>
    %2 = arith.truncf %1 : vector<4x16xf32> to vector<4x16xbf16>
    %c0_2 = arith.constant 0 : index
    %c0_3 = arith.constant 0 : index
    %c0_4 = arith.constant 0 : index
    %3 = vector.load %arg5[%c0_2, %c0_3, %c0_4] : memref<1x8x16xi32, #tpu.memory_space<vmem>>, vector<1x8x16xi32>
    %4 = vector.shape_cast %3 : vector<1x8x16xi32> to vector<8x16xi32>
    %c0_5 = arith.constant 0 : index
    %c0_6 = arith.constant 0 : index
    %c0_7 = arith.constant 0 : index
    %5 = vector.load %arg4[%c0_5, %c0_6, %c0_7] : memref<1x8x16xi32, #tpu.memory_space<vmem>>, vector<1x8x16xi32>
    %6 = vector.shape_cast %5 : vector<1x8x16xi32> to vector<8x16xi32>
    %7 = tpu.iota {dimensions = array<i32: 0>} : vector<16x16xi32>
    %8 = vector.extract_strided_slice %4 {offsets = [0, 0], sizes = [1, 16], strides = [1, 1]} : vector<8x16xi32> to vector<1x16xi32>
    %9 = vector.broadcast %8 : vector<1x16xi32> to vector<16x16xi32>
    %10 = arith.cmpi eq, %7, %9 : vector<16x16xi32>
    %11 = arith.extui %10 : vector<16x16xi1> to vector<16x16xi32>
    %12 = arith.sitofp %11 : vector<16x16xi32> to vector<16x16xf32>
    %13 = arith.truncf %12 : vector<16x16xf32> to vector<16x16xbf16>
    %14 = vector.extract_strided_slice %6 {offsets = [0, 0], sizes = [1, 16], strides = [1, 1]} : vector<8x16xi32> to vector<1x16xi32>
    %15 = vector.broadcast %14 : vector<1x16xi32> to vector<16x16xi32>
    %16 = arith.cmpi eq, %7, %15 : vector<16x16xi32>
    %17 = arith.extui %16 : vector<16x16xi1> to vector<16x16xi32>
    %18 = arith.sitofp %17 : vector<16x16xi32> to vector<16x16xf32>
    %19 = arith.truncf %18 : vector<16x16xf32> to vector<16x16xbf16>
    %cst = arith.constant dense<0.000000e+00> : vector<4x16xf32>
    %20 = tpu.matmul %2, %13, %cst {dimension_numbers = #tpu.dot_dimension_numbers<[1], [0], [0], [1], [0, 0, 1, 1], [], []>} : vector<4x16xbf16>, vector<16x16xbf16>, vector<4x16xf32> -> vector<4x16xf32>
    %cst_8 = arith.constant dense<0.000000e+00> : vector<4x16xf32>
    %21 = tpu.matmul %2, %19, %cst_8 {dimension_numbers = #tpu.dot_dimension_numbers<[1], [0], [0], [1], [0, 0, 1, 1], [], []>} : vector<4x16xbf16>, vector<16x16xbf16>, vector<4x16xf32> -> vector<4x16xf32>
    %22 = arith.subf %20, %21 : vector<4x16xf32>
    %23 = vector.extract_strided_slice %4 {offsets = [1, 0], sizes = [1, 16], strides = [1, 1]} : vector<8x16xi32> to vector<1x16xi32>
    %24 = vector.broadcast %23 : vector<1x16xi32> to vector<16x16xi32>
    %25 = arith.cmpi eq, %7, %24 : vector<16x16xi32>
    %26 = arith.extui %25 : vector<16x16xi1> to vector<16x16xi32>
    %27 = arith.sitofp %26 : vector<16x16xi32> to vector<16x16xf32>
    %28 = arith.truncf %27 : vector<16x16xf32> to vector<16x16xbf16>
    %29 = vector.extract_strided_slice %6 {offsets = [1, 0], sizes = [1, 16], strides = [1, 1]} : vector<8x16xi32> to vector<1x16xi32>
    %30 = vector.broadcast %29 : vector<1x16xi32> to vector<16x16xi32>
    %31 = arith.cmpi eq, %7, %30 : vector<16x16xi32>
    %32 = arith.extui %31 : vector<16x16xi1> to vector<16x16xi32>
    %33 = arith.sitofp %32 : vector<16x16xi32> to vector<16x16xf32>
    %34 = arith.truncf %33 : vector<16x16xf32> to vector<16x16xbf16>
    %cst_9 = arith.constant dense<0.000000e+00> : vector<4x16xf32>
    %35 = tpu.matmul %2, %28, %cst_9 {dimension_numbers = #tpu.dot_dimension_numbers<[1], [0], [0], [1], [0, 0, 1, 1], [], []>} : vector<4x16xbf16>, vector<16x16xbf16>, vector<4x16xf32> -> vector<4x16xf32>
    %cst_10 = arith.constant dense<0.000000e+00> : vector<4x16xf32>
    %36 = tpu.matmul %2, %34, %cst_10 {dimension_numbers = #tpu.dot_dimension_numbers<[1], [0], [0], [1], [0, 0, 1, 1], [], []>} : vector<4x16xbf16>, vector<16x16xbf16>, vector<4x16xf32> -> vector<4x16xf32>
    %37 = arith.subf %35, %36 : vector<4x16xf32>
    %38 = arith.maximumf %22, %37 : vector<4x16xf32>
    %39 = vector.extract_strided_slice %4 {offsets = [2, 0], sizes = [1, 16], strides = [1, 1]} : vector<8x16xi32> to vector<1x16xi32>
    %40 = vector.broadcast %39 : vector<1x16xi32> to vector<16x16xi32>
    %41 = arith.cmpi eq, %7, %40 : vector<16x16xi32>
    %42 = arith.extui %41 : vector<16x16xi1> to vector<16x16xi32>
    %43 = arith.sitofp %42 : vector<16x16xi32> to vector<16x16xf32>
    %44 = arith.truncf %43 : vector<16x16xf32> to vector<16x16xbf16>
    %45 = vector.extract_strided_slice %6 {offsets = [2, 0], sizes = [1, 16], strides = [1, 1]} : vector<8x16xi32> to vector<1x16xi32>
    %46 = vector.broadcast %45 : vector<1x16xi32> to vector<16x16xi32>
    %47 = arith.cmpi eq, %7, %46 : vector<16x16xi32>
    %48 = arith.extui %47 : vector<16x16xi1> to vector<16x16xi32>
    %49 = arith.sitofp %48 : vector<16x16xi32> to vector<16x16xf32>
    %50 = arith.truncf %49 : vector<16x16xf32> to vector<16x16xbf16>
    %cst_11 = arith.constant dense<0.000000e+00> : vector<4x16xf32>
    %51 = tpu.matmul %2, %44, %cst_11 {dimension_numbers = #tpu.dot_dimension_numbers<[1], [0], [0], [1], [0, 0, 1, 1], [], []>} : vector<4x16xbf16>, vector<16x16xbf16>, vector<4x16xf32> -> vector<4x16xf32>
    %cst_12 = arith.constant dense<0.000000e+00> : vector<4x16xf32>
    %52 = tpu.matmul %2, %50, %cst_12 {dimension_numbers = #tpu.dot_dimension_numbers<[1], [0], [0], [1], [0, 0, 1, 1], [], []>} : vector<4x16xbf16>, vector<16x16xbf16>, vector<4x16xf32> -> vector<4x16xf32>
    %53 = arith.subf %51, %52 : vector<4x16xf32>
    %54 = arith.maximumf %38, %53 : vector<4x16xf32>
    %55 = vector.extract_strided_slice %4 {offsets = [3, 0], sizes = [1, 16], strides = [1, 1]} : vector<8x16xi32> to vector<1x16xi32>
    %56 = vector.broadcast %55 : vector<1x16xi32> to vector<16x16xi32>
    %57 = arith.cmpi eq, %7, %56 : vector<16x16xi32>
    %58 = arith.extui %57 : vector<16x16xi1> to vector<16x16xi32>
    %59 = arith.sitofp %58 : vector<16x16xi32> to vector<16x16xf32>
    %60 = arith.truncf %59 : vector<16x16xf32> to vector<16x16xbf16>
    %61 = vector.extract_strided_slice %6 {offsets = [3, 0], sizes = [1, 16], strides = [1, 1]} : vector<8x16xi32> to vector<1x16xi32>
    %62 = vector.broadcast %61 : vector<1x16xi32> to vector<16x16xi32>
    %63 = arith.cmpi eq, %7, %62 : vector<16x16xi32>
    %64 = arith.extui %63 : vector<16x16xi1> to vector<16x16xi32>
    %65 = arith.sitofp %64 : vector<16x16xi32> to vector<16x16xf32>
    %66 = arith.truncf %65 : vector<16x16xf32> to vector<16x16xbf16>
    %cst_13 = arith.constant dense<0.000000e+00> : vector<4x16xf32>
    %67 = tpu.matmul %2, %60, %cst_13 {dimension_numbers = #tpu.dot_dimension_numbers<[1], [0], [0], [1], [0, 0, 1, 1], [], []>} : vector<4x16xbf16>, vector<16x16xbf16>, vector<4x16xf32> -> vector<4x16xf32>
    %cst_14 = arith.constant dense<0.000000e+00> : vector<4x16xf32>
    %68 = tpu.matmul %2, %66, %cst_14 {dimension_numbers = #tpu.dot_dimension_numbers<[1], [0], [0], [1], [0, 0, 1, 1], [], []>} : vector<4x16xbf16>, vector<16x16xbf16>, vector<4x16xf32> -> vector<4x16xf32>
    %69 = arith.subf %67, %68 : vector<4x16xf32>
    %70 = arith.maximumf %54, %69 : vector<4x16xf32>
    %71 = vector.extract_strided_slice %4 {offsets = [4, 0], sizes = [1, 16], strides = [1, 1]} : vector<8x16xi32> to vector<1x16xi32>
    %72 = vector.broadcast %71 : vector<1x16xi32> to vector<16x16xi32>
    %73 = arith.cmpi eq, %7, %72 : vector<16x16xi32>
    %74 = arith.extui %73 : vector<16x16xi1> to vector<16x16xi32>
    %75 = arith.sitofp %74 : vector<16x16xi32> to vector<16x16xf32>
    %76 = arith.truncf %75 : vector<16x16xf32> to vector<16x16xbf16>
    %77 = vector.extract_strided_slice %6 {offsets = [4, 0], sizes = [1, 16], strides = [1, 1]} : vector<8x16xi32> to vector<1x16xi32>
    %78 = vector.broadcast %77 : vector<1x16xi32> to vector<16x16xi32>
    %79 = arith.cmpi eq, %7, %78 : vector<16x16xi32>
    %80 = arith.extui %79 : vector<16x16xi1> to vector<16x16xi32>
    %81 = arith.sitofp %80 : vector<16x16xi32> to vector<16x16xf32>
    %82 = arith.truncf %81 : vector<16x16xf32> to vector<16x16xbf16>
    %cst_15 = arith.constant dense<0.000000e+00> : vector<4x16xf32>
    %83 = tpu.matmul %2, %76, %cst_15 {dimension_numbers = #tpu.dot_dimension_numbers<[1], [0], [0], [1], [0, 0, 1, 1], [], []>} : vector<4x16xbf16>, vector<16x16xbf16>, vector<4x16xf32> -> vector<4x16xf32>
    %cst_16 = arith.constant dense<0.000000e+00> : vector<4x16xf32>
    %84 = tpu.matmul %2, %82, %cst_16 {dimension_numbers = #tpu.dot_dimension_numbers<[1], [0], [0], [1], [0, 0, 1, 1], [], []>} : vector<4x16xbf16>, vector<16x16xbf16>, vector<4x16xf32> -> vector<4x16xf32>
    %85 = arith.subf %83, %84 : vector<4x16xf32>
    %86 = arith.maximumf %70, %85 : vector<4x16xf32>
    %87 = vector.extract_strided_slice %4 {offsets = [5, 0], sizes = [1, 16], strides = [1, 1]} : vector<8x16xi32> to vector<1x16xi32>
    %88 = vector.broadcast %87 : vector<1x16xi32> to vector<16x16xi32>
    %89 = arith.cmpi eq, %7, %88 : vector<16x16xi32>
    %90 = arith.extui %89 : vector<16x16xi1> to vector<16x16xi32>
    %91 = arith.sitofp %90 : vector<16x16xi32> to vector<16x16xf32>
    %92 = arith.truncf %91 : vector<16x16xf32> to vector<16x16xbf16>
    %93 = vector.extract_strided_slice %6 {offsets = [5, 0], sizes = [1, 16], strides = [1, 1]} : vector<8x16xi32> to vector<1x16xi32>
    %94 = vector.broadcast %93 : vector<1x16xi32> to vector<16x16xi32>
    %95 = arith.cmpi eq, %7, %94 : vector<16x16xi32>
    %96 = arith.extui %95 : vector<16x16xi1> to vector<16x16xi32>
    %97 = arith.sitofp %96 : vector<16x16xi32> to vector<16x16xf32>
    %98 = arith.truncf %97 : vector<16x16xf32> to vector<16x16xbf16>
    %cst_17 = arith.constant dense<0.000000e+00> : vector<4x16xf32>
    %99 = tpu.matmul %2, %92, %cst_17 {dimension_numbers = #tpu.dot_dimension_numbers<[1], [0], [0], [1], [0, 0, 1, 1], [], []>} : vector<4x16xbf16>, vector<16x16xbf16>, vector<4x16xf32> -> vector<4x16xf32>
    %cst_18 = arith.constant dense<0.000000e+00> : vector<4x16xf32>
    %100 = tpu.matmul %2, %98, %cst_18 {dimension_numbers = #tpu.dot_dimension_numbers<[1], [0], [0], [1], [0, 0, 1, 1], [], []>} : vector<4x16xbf16>, vector<16x16xbf16>, vector<4x16xf32> -> vector<4x16xf32>
    %101 = arith.subf %99, %100 : vector<4x16xf32>
    %102 = arith.maximumf %86, %101 : vector<4x16xf32>
    %103 = vector.extract_strided_slice %4 {offsets = [6, 0], sizes = [1, 16], strides = [1, 1]} : vector<8x16xi32> to vector<1x16xi32>
    %104 = vector.broadcast %103 : vector<1x16xi32> to vector<16x16xi32>
    %105 = arith.cmpi eq, %7, %104 : vector<16x16xi32>
    %106 = arith.extui %105 : vector<16x16xi1> to vector<16x16xi32>
    %107 = arith.sitofp %106 : vector<16x16xi32> to vector<16x16xf32>
    %108 = arith.truncf %107 : vector<16x16xf32> to vector<16x16xbf16>
    %109 = vector.extract_strided_slice %6 {offsets = [6, 0], sizes = [1, 16], strides = [1, 1]} : vector<8x16xi32> to vector<1x16xi32>
    %110 = vector.broadcast %109 : vector<1x16xi32> to vector<16x16xi32>
    %111 = arith.cmpi eq, %7, %110 : vector<16x16xi32>
    %112 = arith.extui %111 : vector<16x16xi1> to vector<16x16xi32>
    %113 = arith.sitofp %112 : vector<16x16xi32> to vector<16x16xf32>
    %114 = arith.truncf %113 : vector<16x16xf32> to vector<16x16xbf16>
    %cst_19 = arith.constant dense<0.000000e+00> : vector<4x16xf32>
    %115 = tpu.matmul %2, %108, %cst_19 {dimension_numbers = #tpu.dot_dimension_numbers<[1], [0], [0], [1], [0, 0, 1, 1], [], []>} : vector<4x16xbf16>, vector<16x16xbf16>, vector<4x16xf32> -> vector<4x16xf32>
    %cst_20 = arith.constant dense<0.000000e+00> : vector<4x16xf32>
    %116 = tpu.matmul %2, %114, %cst_20 {dimension_numbers = #tpu.dot_dimension_numbers<[1], [0], [0], [1], [0, 0, 1, 1], [], []>} : vector<4x16xbf16>, vector<16x16xbf16>, vector<4x16xf32> -> vector<4x16xf32>
    %117 = arith.subf %115, %116 : vector<4x16xf32>
    %118 = arith.maximumf %102, %117 : vector<4x16xf32>
    %119 = vector.extract_strided_slice %4 {offsets = [7, 0], sizes = [1, 16], strides = [1, 1]} : vector<8x16xi32> to vector<1x16xi32>
    %120 = vector.broadcast %119 : vector<1x16xi32> to vector<16x16xi32>
    %121 = arith.cmpi eq, %7, %120 : vector<16x16xi32>
    %122 = arith.extui %121 : vector<16x16xi1> to vector<16x16xi32>
    %123 = arith.sitofp %122 : vector<16x16xi32> to vector<16x16xf32>
    %124 = arith.truncf %123 : vector<16x16xf32> to vector<16x16xbf16>
    %125 = vector.extract_strided_slice %6 {offsets = [7, 0], sizes = [1, 16], strides = [1, 1]} : vector<8x16xi32> to vector<1x16xi32>
    %126 = vector.broadcast %125 : vector<1x16xi32> to vector<16x16xi32>
    %127 = arith.cmpi eq, %7, %126 : vector<16x16xi32>
    %128 = arith.extui %127 : vector<16x16xi1> to vector<16x16xi32>
    %129 = arith.sitofp %128 : vector<16x16xi32> to vector<16x16xf32>
    %130 = arith.truncf %129 : vector<16x16xf32> to vector<16x16xbf16>
    %cst_21 = arith.constant dense<0.000000e+00> : vector<4x16xf32>
    %131 = tpu.matmul %2, %124, %cst_21 {dimension_numbers = #tpu.dot_dimension_numbers<[1], [0], [0], [1], [0, 0, 1, 1], [], []>} : vector<4x16xbf16>, vector<16x16xbf16>, vector<4x16xf32> -> vector<4x16xf32>
    %cst_22 = arith.constant dense<0.000000e+00> : vector<4x16xf32>
    %132 = tpu.matmul %2, %130, %cst_22 {dimension_numbers = #tpu.dot_dimension_numbers<[1], [0], [0], [1], [0, 0, 1, 1], [], []>} : vector<4x16xbf16>, vector<16x16xbf16>, vector<4x16xf32> -> vector<4x16xf32>
    %133 = arith.subf %131, %132 : vector<4x16xf32>
    %134 = arith.maximumf %118, %133 : vector<4x16xf32>
    %c0_23 = arith.constant 0 : index
    %c0_24 = arith.constant 0 : index
    %c0_25 = arith.constant 0 : index
    %135 = vector.load %arg3[%c0_23, %c0_24, %c0_25] : memref<1x4x16xf32, #tpu.memory_space<vmem>>, vector<1x4x16xf32>
    %136 = vector.shape_cast %135 : vector<1x4x16xf32> to vector<4x16xf32>
    %137 = tpu.concatenate %136, %134 in 0 : vector<4x16xf32>, vector<4x16xf32> -> vector<8x16xf32>
    %c0_26 = arith.constant 0 : index
    %c0_27 = arith.constant 0 : index
    %138 = vector.load %arg6[%c0_26, %c0_27] : memref<8x8xf32, #tpu.memory_space<vmem>>, vector<8x8xf32>
    %cst_28 = arith.constant dense<0.000000e+00> : vector<8x16xf32>
    %139 = tpu.matmul %138, %137, %cst_28 {dimension_numbers = #tpu.dot_dimension_numbers<[1], [0], [0], [1], [0, 0, 1, 1], [], []>} : vector<8x8xf32>, vector<8x16xf32>, vector<8x16xf32> -> vector<8x16xf32>
    %c0_29 = arith.constant 0 : index
    %c0_30 = arith.constant 0 : index
    %140 = vector.load %arg7[%c0_29, %c0_30] : memref<8x1xf32, #tpu.memory_space<vmem>>, vector<8x1xf32>
    %141 = vector.broadcast %140 : vector<8x1xf32> to vector<8x16xf32>
    %142 = arith.addf %139, %141 : vector<8x16xf32>
    %cst_31 = arith.constant 0.000000e+00 : f32
    %143 = vector.broadcast %cst_31 : f32 to vector<8x16xf32>
    %144 = arith.maximumf %142, %143 : vector<8x16xf32>
    %c0_32 = arith.constant 0 : index
    %c0_33 = arith.constant 0 : index
    %c0_34 = arith.constant 0 : index
    %145 = vector.load %arg8[%c0_32, %c0_33, %c0_34] : memref<1x8x16xf32, #tpu.memory_space<vmem>>, vector<1x8x16xf32>
    %146 = vector.shape_cast %145 : vector<1x8x16xf32> to vector<8x16xf32>
    %147 = vector.shape_cast %144 : vector<8x16xf32> to vector<1x8x16xf32>
    tpu.vector_store %arg8[%c0_32, %c0_33, %c0_34], %147 {strides = array<i32>} : memref<1x8x16xf32, #tpu.memory_space<vmem>>, vector<1x8x16xf32>,
    return
  }
  func.func @transform_0(%arg0: i32, %arg1: i32) -> (i32, i32, i32) {
    %c0_i32 = arith.constant 0 : i32
    %c0_i32_0 = arith.constant 0 : i32
    %c0_i32_1 = arith.constant 0 : i32
    return %arg0, %c0_i32, %c0_i32_0 : i32, i32, i32
  }
  func.func @transform_1(%arg0: i32, %arg1: i32) -> (i32, i32, i32) {
    %c0_i32 = arith.constant 0 : i32
    %c0_i32_0 = arith.constant 0 : i32
    return %arg0, %c0_i32, %arg1 : i32, i32, i32
  }
  func.func @transform_2(%arg0: i32, %arg1: i32) -> (i32, i32, i32) {
    %c0_i32 = arith.constant 0 : i32
    %c0_i32_0 = arith.constant 0 : i32
    return %arg0, %c0_i32, %arg1 : i32, i32, i32
  }
  func.func @transform_3(%arg0: i32, %arg1: i32) -> (i32, i32, i32) {
    %c0_i32 = arith.constant 0 : i32
    %c0_i32_0 = arith.constant 0 : i32
    return %arg0, %c0_i32, %arg1 : i32, i32, i32
  }
  func.func @transform_4(%arg0: i32, %arg1: i32) -> (i32, i32) {
    %c0_i32 = arith.constant 0 : i32
    %c0_i32_0 = arith.constant 0 : i32
    %c0_i32_1 = arith.constant 0 : i32
    return %c0_i32, %c0_i32_0 : i32, i32
  }
  func.func @transform_5(%arg0: i32, %arg1: i32) -> (i32, i32) {
    %c0_i32 = arith.constant 0 : i32
    %c0_i32_0 = arith.constant 0 : i32
    %c0_i32_1 = arith.constant 0 : i32
    return %c0_i32, %c0_i32_0 : i32, i32
  }
  func.func @transform_6(%arg0: i32, %arg1: i32) -> (i32, i32, i32) {
    %c0_i32 = arith.constant 0 : i32
    %c0_i32_0 = arith.constant 0 : i32
    return %arg0, %c0_i32, %arg1 : i32, i32, i32
  }
}

</mosaic_0001>

<bundles_post_ra>
// kernel: tpu_custom_call.1
= control target key start
LH: loop header
LB: loop body
LE: loop exit
PB: predicated region body
PF: predicated region fallthrough
CT: control target
= control target key end

     0   :  { %s1795_s0 = inlined_call_operand.vmem [shape: f32[2,4,16], index: 0, kind: input, shape index: {}]   ;;  %s1796_s1 = inlined_call_operand.hbm [shape: f32[2,4,16], index: 1, kind: input, shape index: {}]   ;;  %s1797_s2 = inlined_call_operand.hbm [shape: s32[2,8,16], index: 2, kind: input, shape index: {}]   ;;  %s1798_s3 = inlined_call_operand.hbm [shape: s32[2,8,16], index: 3, kind: input, shape index: {}]   ;;  %s1799_s4 = inlined_call_operand.hbm [shape: f32[8,8], index: 4, kind: input, shape index: {}]   ;;  %s1800_s5 = inlined_call_operand.vmem [shape: f32[8,1], index: 5, kind: input, shape index: {}]   ;;  %s1801_s6 = inlined_call_operand.hbm [shape: f32[2,8,16], index: 6, kind: output, shape index: {}]  }
   0x1   :  { %1808 = sst [smem:[#allocation20_spill]] %s1797_s2 }
   0x2   :  { %1809 = sst [smem:[#allocation21_spill]] %s1798_s3 }
   0x3   :  { %1810 = sst [smem:[#allocation22_spill]] %s1799_s4 }
   0x4   :  { %11 = vsyncpa [#allocation3], 0 }
   0x5   :  { %13 = vsyncpa [#allocation3 + $0x1], 0 }
   0x6   :  { %14 = vsyncpa [#allocation6], 0 }
   0x7   :  { %16 = vsyncpa [#allocation6 + $0x1], 0 }
   0x8   :  { %17 = vsyncpa [#allocation9], 0 }
   0x9   :  { %18 = vsyncpa [#allocation4], 0 }
   0xa   :  { %20 = vsyncpa [#allocation4 + $0x1], 0  ;;  %s1404_s21 = smov 0   ;;  %s1406_s22 = smov 0  }
   0xb   :  { %s1408_s23 = smov 0   ;;  %s1410_s24 = smov 0  }
   0xc   :  { %s1412_s25 = smov 0   ;;  %s1414_s26 = smov 0  }
   0xd LB: > { %1811 = sst [smem:[#allocation15_spill]] %s1352_s23  ;;  %s38_s27 = sadd.s32 1, %s1360_s25  ;;  %s1364_s26 = sphi %s1414_s26, %s26_s26   ;;  %s1360_s25 = sphi %s1412_s25, %s1861_s25   ;;  %s1356_s24 = sphi %s1410_s24, %s1860_s24   ;;  %s1352_s23 = sphi %s1408_s23, %s1856_s23   ;;  %s1348_s22 = sphi %s1406_s22, %s1859_s22   ;;  %s1344_s21 = sphi %s1404_s21, %s1858_s21  }
   0xe   : > { %1812 = sst [smem:[#allocation16_spill]] %s1364_s26  ;;  %s73_s28 = sadd.s32 1, %s1352_s23 }
   0xf   : > { %p40_p0 = scmp.ge.s32.totalorder %s38_s27, 2  ;;  %p80_p1 = scmp.ne.s32.totalorder %s1352_s23, %s1348_s22 }
  0x10   : > { %p81_p2 = scmp.eq.s32.totalorder %s1364_s26, 0  ;;  %p969_p3 = scmp.ge.s32.totalorder %s1364_s26, 2 }
  0x11   : > { %s1863_s27 = smov (%p40_p0, %s38_s27), 0  ;;  %p1099_p5 = scmp.lt.s32.totalorder %s1364_s26, 2 }
  0x12   : > { %1813 = sst [smem:[#allocation17_spill]] %s1863_s27  ;;  %p82_p4 = por %p81_p2, %p80_p1 }
  0x13   : > { %s68_s29 = ssub.s32 %s1360_s25, %s1863_s27  ;;  %s1449_s30 = sand.u32 1, %s1352_s23  }
  0x14   : > { %p71_p6 = scmp.eq.s32.totalorder %s68_s29, 0  ;;  %p1451_p7 = pnand %p1099_p5, %p82_p4 }
  0x15   : > { %s278_s8 = sand.u32 1, %s1364_s26   ;;  %s1802_s9 = sshll.u32 %s1449_s30, 3 }
  0x16   : > { %s1458_s10 = scalar_select %p71_p6, %s1352_s23, %s73_s28  }
  0x17   : > { %s973_s11 = sshll.u32 %s1360_s25, 3  ;;  %s1816_s2 = sld [smem:[#allocation20_spill]] }
  0x18   : > { %1815 = sst [smem:[#allocation18_spill]] %s1458_s10  ;;  %s282_s15 = scalar_lea.vmem [#allocation5], %s1802_s9 }
  0x19   : > { %s291_s16 = sshll.u32 %s282_s15, 4  ;;  %s1466_s18 = scalar_lea.sflag [#allocation6], %s278_s8  ;;  %s292_s16 = int_to_ptr.vmem [resolvable:$true] %s291_s16 }
  0x1a   : > { %s1817_s3 = sld [smem:[#allocation21_spill]]  ;;  %s1477_s29 = sadd.s32 4294967295, %s1364_s26  }
  0x1b   : > { %s966_s12 = sadd.s32 4294967294, %s1364_s26   ;;  %p86_p8 = scmp.ne.s32.totalorder %s1348_s22, %s1344_s21 }
  0x1c   : > { %p87_p9 = scmp.eq.s32.totalorder %s1477_s29, 0  ;;  %p210_p10 = scmp.eq.s32.totalorder %s1477_s29, 1 }
  0x1d   : > { %s287_s14 = scalar_lea.hbm %s1816_s2, %s973_s11  ;;  %p216_p11 = scmp.eq.s32.totalorder %s966_s12, 1 }
  0x1e   : > { %s289_s17 = sshll.u32 %s287_s14, 4  ;;  %p967_p12 = scmp.ge.s32.totalorder %s1364_s26, 1  ;;  %s290_s17 = int_to_ptr.hbm [resolvable:$true] %s289_s17 }
  0x1f   : > { %1090 = dma.hbm_to_vmem [thread:$0]  (!%p1451_p7), %s290_s17, 128, %s292_s16, %s1466_s18  }
  0x20   : > { %s1474_s28 = scalar_lea.hbm %s1817_s3, %s973_s11  ;;  %p1487_p13 = por %p87_p9, %p86_p8 }
  0x21   : > { %p1494_p0 = por %p210_p10, %p80_p1  ;;  %p1498_p2 = por %p216_p11, %p86_p8 }
  0x22   : > { %p223_p4 = scmp.lt.s32.totalorder %s1364_s26, 3  ;;  %s1822_s4 = sld [smem:[#allocation22_spill]] }
  0x23   : > { %s1820_s13 = scalar_select %p1498_p2, 1, 0 }
  0x24   : > { %p1506_p5 = pnand %p967_p12, %p223_p4  ;;  %s1366_s19 = smov [#allocation8]  }
  0x25   : > { %1821 = sst [smem:[#allocation19_spill]] %s1820_s13  ;;  %s237_s20 = sshll.u32 %s1366_s19, 4  ;;  %s238_s20 = int_to_ptr.vmem [resolvable:$true] %s237_s20 }
  0x26   : > { %p1080_p1 = pneg %p1506_p5  ;;  %s970_s12 = sshll.u32 %s1449_s30, 2 }
  0x27   : > { %s971_s14 = sshll.u32 %s1360_s25, 2  ;;  %s262_s15 = scalar_lea.vmem [#allocation2], %s970_s12 }
  0x28   : > { %s235_s16 = sshll.u32 %s1822_s4, 4  ;;  %p1081_p6 = pnand %p1080_p1, %p87_p9  ;;  %s236_s16 = int_to_ptr.hbm [resolvable:$true] %s235_s16 }
  0x29   : > { %s271_s9 = sshll.u32 %s262_s15, 4  ;;  %s267_s4 = scalar_lea.hbm %s1796_s1, %s971_s14  ;;  %s272_s9 = int_to_ptr.vmem [resolvable:$true] %s271_s9 }
  0x2a   : > { %1083 = dma.hbm_to_vmem [thread:$0]  (!%p1081_p6), %s236_s16, 128, %s238_s20, [#allocation9]  }
  0x2b   : > { %s269_s27 = sshll.u32 %s267_s4, 4  ;;  %s309_s10 = sshll.u32 %s1474_s28, 4  ;;  %s270_s27 = int_to_ptr.hbm [resolvable:$true] %s269_s27  ;;  %s310_s10 = int_to_ptr.hbm [resolvable:$true] %s309_s10 }
  0x2c   : > { %s259_s19 = scalar_lea.sflag [#allocation3], %s1449_s30  ;;  %s1824_s23 = sshll.u32 %s1449_s30, 3 }
  0x2d   : > { %1087 = dma.hbm_to_vmem [thread:$0]  (!%p1451_p7), %s270_s27, 64, %s272_s9, %s259_s19  }
  0x2e   : > { %s302_s26 = scalar_lea.vmem [#allocation7], %s1824_s23  ;;  %320 = sbr.rel (%p1506_p5) target bundleno = 392 (0x188), region = 44 }
  0x2f   : > { %s311_s13 = sshll.u32 %s302_s26, 4  ;;  %s1531_s2 = sand.u32 (!%p1506_p5), 1, %s1348_s22   ;;  %s312_s13 = int_to_ptr.vmem [resolvable:$true] %s311_s13 }
  0x30   : > { %1093 = dma.hbm_to_vmem [thread:$0]  (!%p1451_p7), %s310_s10, 128, %s312_s13, %s1466_s18  }
  0x31   : > { %s977_s3 = sshll.u32 (!%p1506_p5), %s1531_s2, 2  ;;  %s323_s4 = scalar_lea.sflag (!%p1506_p5), [#allocation3], %s1531_s2 }
  0x32   : > { %s1535_s28 = scalar_lea.vmem (!%p1506_p5), [#allocation2], %s977_s3 }
  0x33   : > { %1327 = dma.done.wait (%p1487_p13), %s323_s4, 64  }
  0x34   : > { %1329 = vsyncadd (%p1487_p13), %s323_s4, 4294967232  ;;  %s332_s23 = sand.u32 1, %s1477_s29   ;;  %s1543_s26 = sshll.u32 %s1531_s2, 3 }
  0x35   : > { %s333_s27 = scalar_lea.sflag [#allocation6], %s332_s23  ;;  %s336_s30 = scalar_lea.vmem [#allocation5], %s1543_s26 }
  0x36   : > { %1331 = dma.done.wait (%p1487_p13), %s333_s27, 256  }
  0x37   : > { %1333 = vsyncadd (%p1487_p13), %s333_s27, 4294967040  ;;  %s346_s7 = scalar_lea.vmem [#allocation7], %s1543_s26 }
  0x38   : > { %1335 = dma.done.wait (%p87_p9), [#allocation9], 128  }
  0x39   : > { %1337 = vsyncadd (%p87_p9), [#allocation9], 4294967168  ;;  %p395_p7 = scmp.lt.s32.totalorder %s1356_s24, 1  ;;  %v404_v0 = vlaneseq  ;;  %v1565_v4 = vld [vmem:[%s346_s7] sm:$0xff]  ;;  %v1567_v5 = vld [vmem:[%s336_s30] sm:$0xff]  ;;  %vm423_vm10 = vcmask 130048  }
  0x3a   : > { %v407_v7 = vperm.slane %v1565_v4, 0  ;;  %v415_v8 = vperm.slane %v1567_v5, 0  ;;  %v454_v9 = vperm.slane %v1565_v4, 1  ;;  %v462_v10 = vperm.slane %v1567_v5, 1  ;;  %v769_v56 = vld [vmem:[%s1800_s5] sm:$0xff]  ;;  %s1065_s17 = sshll.u32 %s1356_s24, 3 }
  0x3b   : > { %s396_s9 = scalar_select %p395_p7, %s1356_s24, 1  ;;  %v1557_v1 = vshrl.u32 %v404_v0, 7  ;;  %v498_v11 = vperm.slane %v1565_v4, 2  ;;  %v506_v12 = vperm.slane %v1567_v5, 2  ;;  %v542_v13 = vperm.slane %v1565_v4, 3 }
  0x3c   : > { %v1367_v18 = vmov 1.0|1.0   ;;  %v550_v23 = vperm.slane %v1567_v5, 3  ;;  %v586_v24 = vperm.slane %v1565_v4, 4  ;;  %v594_v27 = vperm.slane %v1567_v5, 4  ;;  %s813_s14 = scalar_lea.hbm %s1801_s6, %s1065_s17  ;;  %s394_s15 = scalar_lea.vmem [#allocation10], %s1543_s26 }
  0x3d   : > { %s982_s10 = sshll.u32 %s396_s9, 2  ;;  %v1563_v2 = vadd.s32 8, %v1557_v1  ;;  %vm408_vm0 = vcmp.eq.s32.totalorder %v1557_v1, %v407_v7  ;;  %vm416_vm2 = vcmp.eq.s32.totalorder %v1557_v1, %v415_v8  ;;  %vm1583_vm5 = vcmp.eq.s32.totalorder %v1557_v1, %v454_v9  ;;  %v762_v21 = vld [vmem:[%s1535_s28] sm:$0xf]  ;;  %s815_s19 = sshll.u32 %s394_s15, 4  ;;  %s816_s19 = int_to_ptr.vmem [resolvable:$true] %s815_s19 }
  0x3e   : > { %s398_s8 = scalar_lea.vmem %s1795_s0, %s982_s10  ;;  %vm1593_vm7 = vcmp.eq.s32.totalorder %v1557_v1, %v462_v10  ;;  %vm1604_vm11 = vcmp.eq.s32.totalorder %v1557_v1, %v498_v11  ;;  %vm1619_vm14 = vcmp.eq.s32.totalorder %v1557_v1, %v506_v12  ;;  %v630_v28 = vperm.slane %v1565_v4, 5  ;;  %s817_s3 = sshll.u32 %s813_s14, 4  ;;  %s818_s3 = int_to_ptr.hbm [resolvable:$true] %s817_s3 }
  0x3f   : > { %v400_v3 = vld [vmem:[%s398_s8] sm:$0xf]  ;;  %vm409_vm1 = vcmp.eq.s32.totalorder %v1563_v2, %v407_v7  ;;  %vm417_vm3 = vcmp.eq.s32.totalorder %v1563_v2, %v415_v8  ;;  %vm1588_vm6 = vcmp.eq.s32.totalorder %v1563_v2, %v454_v9  ;;  %vm1598_vm8 = vcmp.eq.s32.totalorder %v1563_v2, %v462_v10  ;;  %s802_s4 = scalar_lea.sflag [#allocation4], %s1531_s2  ;;  %s1288_s28 = sshra.s32 %s818_s3, 4  ;;  %s1289_s28 = int_to_ptr.hbm [resolvable:$true] %s1288_s28 }
  0x40   : > { %v1569_v6 = vpack.c.bf16 %v400_v3, %v400_v3  ;;  %vm987_vm4 = vmpackc.low %vm409_vm1, %vm408_vm0  ;;  %vm1609_vm12 = vcmp.eq.s32.totalorder %v1563_v2, %v498_v11  ;;  %vm1624_vm15 = vcmp.eq.s32.totalorder %v1563_v2, %v506_v12  ;;  %vm1636_vm1 = vcmp.eq.s32.totalorder %v1557_v1, %v542_v13  ;;  %s1290_s24 = scalar_lea.hbm %s1289_s28, 8  ;;  %s1294_s26 = scalar_lea.hbm %s1801_s6, 16 }
  0x41   : > { %988 = vmatpush.bf16.msk.msra.mxu0 %vm987_vm4, %v1367_v18  ;;  %vm990_vm9 = vmpackc.low %vm417_vm3, %vm416_vm2  ;;  %vm1641_vm2 = vcmp.eq.s32.totalorder %v1563_v2, %v542_v13  ;;  %vm1655_vm4 = vcmp.eq.s32.totalorder %v1557_v1, %v550_v23  ;;  %v638_v31 = vperm.slane %v1567_v5, 5  ;;  %v674_v34 = vperm.slane %v1565_v4, 6  ;;  %p1291_p8 = scmp.ne.s32.totalorder %s1289_s28, %s1290_s24  ;;  %p1295_p11 = scmp.lt.s32.totalorder %s1289_s28, %s1801_s6 }
  0x42   : > { %991 = vmatpush.bf16.msk.msra.mxu1 %vm990_vm9, %v1367_v18  ;;  %vm997_vm13 = vmpackc.low %vm1588_vm6, %vm1583_vm5  ;;  %vm1660_vm5 = vcmp.eq.s32.totalorder %v1563_v2, %v550_v23  ;;  %v682_v35 = vperm.slane %v1567_v5, 6  ;;  %v718_v36 = vperm.slane %v1565_v4, 7  ;;  %v726_v37 = vperm.slane %v1567_v5, 7  ;;  %v768_v23 = vld [vmem:[#allocation8] sm:$0xff]  ;;  %p1296_p12 = scmp.lt.s32.totalorder %s1294_s26, %s1290_s24 }
  0x43   : > { %998 = vmatpush.bf16.msk.msra.mxu2 %vm997_vm13, %v1367_v18  ;;  %vm1000_vm0 = vmpackc.low %vm1598_vm8, %vm1593_vm7  ;;  %vm1673_vm7 = vcmp.eq.s32.totalorder %v1557_v1, %v586_v24  ;;  %vm1678_vm8 = vcmp.eq.s32.totalorder %v1563_v2, %v586_v24  ;;  %v1368_v57 = vmov 0   ;;  %p1292_p9 = pnand %p1291_p8, %p1494_p0 }
  0x44   : > { %1001 = vmatpush.bf16.msk.msra.mxu3 %vm1000_vm0, %v1367_v18  ;;  %989 = vmatmul.msk.bf16.vlgmr.msra.gmra.mxu0 %vm423_vm10, %v1569_v6  ;;  %vm1007_vm3 = vmpackc.low %vm1609_vm12, %vm1604_vm11  ;;  %vm595_vm11 = vcmp.eq.s32.totalorder %v1557_v1, %v594_v27  ;;  %vm596_vm12 = vcmp.eq.s32.totalorder %v1563_v2, %v594_v27  ;;  %p1297_p13 = por %p1296_p12, %p1295_p11 }
  0x45   : > { %992 = vmatmul.msk.bf16.vlgmr.msra.gmra.mxu1 %vm423_vm10, %v1569_v6  ;;  %1008 = vmatpush.bf16.msk.msrb.mxu0 %vm1007_vm3, %v1367_v18  ;;  %vm1010_vm6 = vmpackc.low %vm1624_vm15, %vm1619_vm14  ;;  %vm631_vm14 = vcmp.eq.s32.totalorder %v1557_v1, %v630_v28  ;;  %vm632_vm15 = vcmp.eq.s32.totalorder %v1563_v2, %v630_v28  ;;  %p1293_p10 = pneg %p1292_p9 }
  0x46   : > { %999 = vmatmul.msk.bf16.vlgmr.msra.gmra.mxu2 %vm423_vm10, %v1569_v6  ;;  %1011 = vmatpush.bf16.msk.msrb.mxu1 %vm1010_vm6, %v1367_v18  ;;  %vm1017_vm9 = vmpackc.low %vm1641_vm2, %vm1636_vm1  ;;  %vm639_vm1 = vcmp.eq.s32.totalorder %v1557_v1, %v638_v31  ;;  %vm640_vm2 = vcmp.eq.s32.totalorder %v1563_v2, %v638_v31  ;;  %vm675_vm6 = vcmp.eq.s32.totalorder %v1557_v1, %v674_v34 }
  0x47   : > { %1002 = vmatmul.msk.bf16.vlgmr.msra.gmra.mxu3 %vm423_vm10, %v1569_v6  ;;  %1018 = vmatpush.bf16.msk.msrb.mxu2 %vm1017_vm9, %v1367_v18  ;;  %vm1020_vm13 = vmpackc.low %vm1660_vm5, %vm1655_vm4  ;;  %vm684_vm9 = vcmp.eq.s32.totalorder %v1563_v2, %v682_v35  ;;  %p1298_p4 = pnand %p1297_p13, %p1293_p10 }
  0x48   : > { %1021 = vmatpush.bf16.msk.msrb.mxu3 %vm1020_vm13, %v1367_v18  ;;  %vm1027_vm0 = vmpackc.low %vm1678_vm8, %vm1673_vm7  ;;  %vm676_vm7 = vcmp.eq.s32.totalorder %v1563_v2, %v674_v34  ;;  %vm683_vm8 = vcmp.eq.s32.totalorder %v1557_v1, %v682_v35  ;;  %1153 = vset.pattern.permute.xlu0 %v1368_v57 }
  0x49   : > { %1028 = vmatpush.bf16.msk.msra.mxu0 %vm1027_vm0, %v1367_v18  ;;  %vm1030_vm3 = vmpackc.low %vm596_vm12, %vm595_vm11  ;;  %vm719_vm11 = vcmp.eq.s32.totalorder %v1557_v1, %v718_v36  ;;  %vm720_vm12 = vcmp.eq.s32.totalorder %v1563_v2, %v718_v36  ;;  %772 = vperm.xlu0 %1153, %v769_v56  }
  0x4a   : > { %1031 = vmatpush.bf16.msk.msra.mxu1 %vm1030_vm3, %v1367_v18  ;;  %vm1037_vm4 = vmpackc.low %vm632_vm15, %vm631_vm14  ;;  %vm727_vm14 = vcmp.eq.s32.totalorder %v1557_v1, %v726_v37  ;;  %vm728_vm15 = vcmp.eq.s32.totalorder %v1563_v2, %v726_v37  ;;  %vm766_vm3 = vcmask 1043456  }
  0x4b   : > { %1038 = vmatpush.bf16.msk.msra.mxu2 %vm1037_vm4, %v1367_v18  ;;  %vm1040_vm5 = vmpackc.low %vm640_vm2, %vm639_vm1  ;;  %vm775_vm4 = vcmask 64512  }
  0x4c   : > { %1041 = vmatpush.bf16.msk.msra.mxu3 %vm1040_vm5, %v1367_v18  ;;  %vm1047_vm13 = vmpackc.low %vm676_vm7, %vm675_vm6 }
  0x4d   : > { %vm1050_vm0 = vmpackc.low %vm684_vm9, %vm683_vm8 }
  0x4e   : > { %vm1057_vm1 = vmpackc.low %vm720_vm12, %vm719_vm11 }
  0x4f   : > { %vm1060_vm2 = vmpackc.low %vm728_vm15, %vm727_vm14 }
  0x54   : > { %1009 = vmatmul.msk.bf16.vlgmr.msrb.gmra.mxu0 %vm423_vm10, %v1569_v6 }
  0x55   : > { %1012 = vmatmul.msk.bf16.vlgmr.msrb.gmra.mxu1 %vm423_vm10, %v1569_v6  ;;  %1048 = vmatpush.bf16.msk.msrb.mxu0 %vm1047_vm13, %v1367_v18 }
  0x56   : > { %1019 = vmatmul.msk.bf16.vlgmr.msrb.gmra.mxu2 %vm423_vm10, %v1569_v6  ;;  %1051 = vmatpush.bf16.msk.msrb.mxu1 %vm1050_vm0, %v1367_v18 }
  0x57   : > { %1022 = vmatmul.msk.bf16.vlgmr.msrb.gmra.mxu3 %vm423_vm10, %v1569_v6  ;;  %1058 = vmatpush.bf16.msk.msrb.mxu2 %vm1057_vm1, %v1367_v18 }
  0x58   : > { %1061 = vmatpush.bf16.msk.msrb.mxu3 %vm1060_vm2, %v1367_v18 }
  0x64   : > { %1029 = vmatmul.msk.bf16.vlgmr.msra.gmra.mxu0 %vm423_vm10, %v1569_v6 }
  0x65   : > { %1032 = vmatmul.msk.bf16.vlgmr.msra.gmra.mxu1 %vm423_vm10, %v1569_v6 }
  0x66   : > { %1039 = vmatmul.msk.bf16.vlgmr.msra.gmra.mxu2 %vm423_vm10, %v1569_v6 }
  0x67   : > { %1042 = vmatmul.msk.bf16.vlgmr.msra.gmra.mxu3 %vm423_vm10, %v1569_v6 }
  0x74   : > { %1049 = vmatmul.msk.bf16.vlgmr.msrb.gmra.mxu0 %vm423_vm10, %v1569_v6 }
  0x75   : > { %1052 = vmatmul.msk.bf16.vlgmr.msrb.gmra.mxu1 %vm423_vm10, %v1569_v6 }
  0x76   : > { %1059 = vmatmul.msk.bf16.vlgmr.msrb.gmra.mxu2 %vm423_vm10, %v1569_v6 }
  0x77   : > { %1062 = vmatmul.msk.bf16.vlgmr.msrb.gmra.mxu3 %vm423_vm10, %v1569_v6 }
  0xbb   : > { %v773_v27 = vpop.permute.xlu0 %772 }
  0xc1   : > { %v436_v38 = vpop.f32.mrf.mxu0 }
  0xc2   : > { %v449_v39 = vpop.f32.mrf.mxu1 }
  0xc3   : > { %v453_v63 = vsub.f32 %v436_v38, %v449_v39 }
  0xc9   : > { %v479_v40 = vpop.f32.mrf.mxu2  ;;  %v438_v41 = vpop.f32.mrf.mxu0 }
  0xca   : > { %v492_v42 = vpop.f32.mrf.mxu3  ;;  %v451_v43 = vpop.f32.mrf.mxu1 }
  0xcb   : > { %v496_v62 = vsub.f32 %v479_v40, %v492_v42 }
  0xcd   : > { %v497_v1 = vmax.f32 %v453_v63, %v496_v62 }
  0xd1   : > { %v481_v44 = vpop.f32.mrf.mxu2  ;;  %v523_v45 = vpop.f32.mrf.mxu0 }
  0xd2   : > { %v494_v46 = vpop.f32.mrf.mxu3  ;;  %v536_v47 = vpop.f32.mrf.mxu1 }
  0xd3   : > { %v540_v0 = vsub.f32 %v523_v45, %v536_v47 }
  0xd5   : > { %v541_v7 = vmax.f32 %v497_v1, %v540_v0 }
  0xd9   : > { %v567_v48 = vpop.f32.mrf.mxu2  ;;  %v525_v49 = vpop.f32.mrf.mxu0 }
  0xda   : > { %v580_v50 = vpop.f32.mrf.mxu3  ;;  %v538_v51 = vpop.f32.mrf.mxu1 }
  0xdb   : > { %v584_v2 = vsub.f32 %v567_v48, %v580_v50 }
  0xdd   : > { %v585_v9 = vmax.f32 %v541_v7, %v584_v2 }
  0xe1   : > { %v569_v52 = vpop.f32.mrf.mxu2  ;;  %v611_v53 = vpop.f32.mrf.mxu0 }
  0xe2   : > { %v582_v54 = vpop.f32.mrf.mxu3  ;;  %v624_v55 = vpop.f32.mrf.mxu1 }
  0xe3   : > { %v628_v8 = vsub.f32 %v611_v53, %v624_v55 }
  0xe5   : > { %v629_v11 = vmax.f32 %v585_v9, %v628_v8 }
  0xe9   : > { %v655_v58 = vpop.f32.mrf.mxu2  ;;  %v613_v59 = vpop.f32.mrf.mxu0 }
  0xea   : > { %v668_v60 = vpop.f32.mrf.mxu3  ;;  %v626_v61 = vpop.f32.mrf.mxu1 }
  0xeb   : > { %v672_v10 = vsub.f32 %v655_v58, %v668_v60 }
  0xed   : > { %v673_v13 = vmax.f32 %v629_v11, %v672_v10 }
  0xf1   : > { %v657_v3 = vpop.f32.mrf.mxu2  ;;  %v699_v4 = vpop.f32.mrf.mxu0 }
  0xf2   : > { %v670_v5 = vpop.f32.mrf.mxu3  ;;  %v712_v6 = vpop.f32.mrf.mxu1 }
  0xf3   : > { %v716_v12 = vsub.f32 %v699_v4, %v712_v6 }
  0xf5   : > { %v717_v18 = vmax.f32 %v673_v13, %v716_v12 }
  0xf9   : > { %v743_v14 = vpop.f32.mrf.mxu2  ;;  %v701_v15 = vpop.f32.mrf.mxu0 }
  0xfa   : > { %v756_v16 = vpop.f32.mrf.mxu3  ;;  %v714_v17 = vpop.f32.mrf.mxu1 }
  0xfb   : > { %v760_v19 = vsub.f32 %v743_v14, %v756_v16 }
  0xfd   : > { %v761_v20 = vmax.f32 %v717_v18, %v760_v19 }
  0xff   : > { %v764_v22 = vrot.slane %v761_v20, 4 }
 0x101   : > { %v745_v24 = vpop.f32.mrf.mxu2  ;;  %v767_v25 = vsel %vm766_vm3, %v762_v21, %v764_v22 }
 0x102   : > { %v758_v26 = vpop.f32.mrf.mxu3  ;;  %794 = vmatpush.msra.mxu0 %v767_v25 }
 0x103   : > { %1063 = vmatmul.msk.f32.vlgmr.msra.gmra.mxu0 %vm775_vm4, %v768_v23 }
 0x180   : > { %v796_v28 = vpop.f32.mrf.mxu0 }
 0x181   : > { %v797_v29 = vadd.f32 %v796_v28, %v773_v27 }
 0x183   : > { %v799_v30 = vmax.f32 %v797_v29, 0.0 }
 0x185   : > { %800 = vst.msk [vmem:[%s394_s15] sm:$0xff] %vm423_vm10, %v799_v30 }
 0x186   : > { %1301 = shalt.err (!%p1298_p4)
}
 0x187   : > { %1078 = dma.vmem_to_hbm [thread:$0]  (%p1494_p0), %s816_s19, 128, %s818_s3, %s802_s4  }
 0x188 PF: > { %s1854_s9 = sld [smem:[#allocation16_spill]]  ;;  %s829_s10 = sand.u32 1, %s1344_s21  }
 0x189   : > { %p1095_p5 = pnand %p969_p3, %p1498_p2  ;;  %s830_s18 = scalar_lea.sflag [#allocation4], %s829_s10 }
 0x18b   : > { %p1096_p1 = pneg %p1095_p5 }
 0x18d   : > { %1339 = dma.done.wait (%p1096_p1), %s830_s18, 128  }
 0x18e   : > { %1341 = vsyncadd (%p1096_p1), %s830_s18, 4294967168  ;;  %s26_s26 = sadd.s32 1, %s1854_s9   ;;  %s1855_s13 = sld [smem:[#allocation15_spill]] }
 0x18f   : > { %p23_p6 = scmp.ge.s32.totalorder %s26_s26, 4   ;;  %s1856_s23 = sld [smem:[#allocation18_spill]] }
 0x190   : > { %s1857_s11 = sld [smem:[#allocation17_spill]]  ;;  %s1858_s21 = smov %s1348_s22 }
 0x191   : > { %s1860_s24 = smov %s1360_s25 }
 0x192   :  { %25 = sbr.rel (!%p23_p6) target bundleno = 13 (0xd), region = 120 }
 0x194   : > { %s1859_s22 = smov %s1855_s13 }
 0x196   : > { %s1861_s25 = smov %s1857_s11 }
 0x197   :  { %836 = vsyncpa [#allocation3], 1 }
 0x198   :  { %838 = vsyncpa [#allocation3 + $0x1], 1 }
 0x199   :  { %839 = vsyncpa [#allocation6], 1 }
 0x19a   :  { %841 = vsyncpa [#allocation6 + $0x1], 1 }
 0x19b   :  { %842 = vsyncpa [#allocation9], 1 }
 0x19c   :  { %843 = vsyncpa [#allocation4], 1 }
 0x19d   :  { %845 = vsyncpa [#allocation4 + $0x1], 1 }

</bundles_post_ra>
